<compile_context>
chip_gen: v5e
topology: v5e:2x2
jax: 0.10.0
libtpu: 0.0.40
codegen_flags: <defaults>
</compile_context>

<pallas_src>
import jax
import jax.numpy as jnp
from jax.experimental import pallas as pl
from jax.experimental.pallas import tpu as pltpu

LATENT_DIM = 128
HIDDEN = 256


def _round_up(x, m):
    return ((x + m - 1) // m) * m


def _disc_z_kernel(z_ref, w1_ref, b1_ref, w2_ref, b2_ref, o_ref):
    # Layer 1: (TB, 128) @ (128, 256) on the MXU with bf16 operands
    # (bf16-native on v5e/v6e/v7x), f32 accumulation.  w1_ref is already bf16;
    # the z tile is cast in-kernel so z stays f32 in HBM (module semantics).
    z_bf = z_ref[...].astype(jnp.bfloat16)
    h = jnp.dot(z_bf, w1_ref[...], preferred_element_type=jnp.float32)
    # Epilogue in f32.
    h = h + b1_ref[...]                       # b1 is (1, HIDDEN), broadcasts over rows
    # LeakyReLU(negative_slope=0.2) as mul+max.
    h = jnp.maximum(h, 0.2 * h)
    # Layer 2 (256 -> 1): an N=1 MXU matmul wastes 255/256 result lanes, so do
    # it as a VPU multiply + XLU lane reduction against the (1, 256) weight row.
    logits = jnp.sum(h * w2_ref[...], axis=-1, keepdims=True) + b2_ref[...]
    # Sigmoid: EUP exp + EUP approximate reciprocal (off the vector ALU).
    o_ref[...] = pl.reciprocal(1.0 + jnp.exp(-logits), approx=True)


def discriminator_z_forward(z, w1, b1, w2_row, b2, *, block_b=4096):
    """z: (B, LATENT_DIM) f32. Returns (B, 1) f32 probabilities.

    w1: (LATENT_DIM, HIDDEN), b1: (1, HIDDEN), w2_row: (1, HIDDEN), b2: (1, 1).
    """
    B = z.shape[0]
    z = z.astype(jnp.float32)
    w1_bf = w1.astype(jnp.bfloat16)  # one-time tiny cast of the MXU RHS operand

    if B <= 8:
        # Block dims equal to the full array dims -> legal without the 8-row rule.
        tb = B
    else:
        # >= 2 grid steps for mid-size batches (v7x megacore sharding of the
        # "parallel" axis), 8-row sublane floor, block_b ceiling for large B.
        tb = min(block_b, max(8, _round_up(pl.cdiv(B, 2), 8)))

    grid = (pl.cdiv(B, tb),)
    out = pl.pallas_call(
        _disc_z_kernel,
        out_shape=jax.ShapeDtypeStruct((B, 1), jnp.float32),
        grid_spec=pltpu.PrefetchScalarGridSpec(
            num_scalar_prefetch=0,
            grid=grid,
            in_specs=[
                # z: one (tb, 128) tile per grid step -> auto double-buffered.
                # The ragged last block (when tb doesn't divide B) is clamped
                # by Pallas; garbage rows only feed discarded output rows.
                pl.BlockSpec((tb, LATENT_DIM), lambda i: (i, 0)),
                # Weights / biases: constant block index -> DMA'd once, then
                # resident in VMEM for every grid step.
                pl.BlockSpec((LATENT_DIM, HIDDEN), lambda i: (0, 0)),
                pl.BlockSpec((1, HIDDEN), lambda i: (0, 0)),
                pl.BlockSpec((1, HIDDEN), lambda i: (0, 0)),
                pl.BlockSpec((1, 1), lambda i: (0, 0)),
            ],
            # (tb, 1) column output; output traffic is ~1/128 of z traffic, so
            # the lane-dense-output transpose is not worth paying unmeasured.
            out_specs=pl.BlockSpec((tb, 1), lambda i: (i, 0)),
        ),
        compiler_params=pltpu.CompilerParams(
            dimension_semantics=("parallel",),
        ),
    )(z, w1_bf, b1, w2_row, b2)
    return out


def init_params(key):
    """Deterministic init mimicking PyTorch's uniform(-1/sqrt(fan_in), 1/sqrt(fan_in))."""
    k1, k2, k3, k4 = jax.random.split(key, 4)
    bound1 = 1.0 / (LATENT_DIM ** 0.5)
    bound2 = 1.0 / (HIDDEN ** 0.5)
    w1 = jax.random.uniform(k1, (LATENT_DIM, HIDDEN), jnp.float32, -bound1, bound1)
    b1 = jax.random.uniform(k2, (1, HIDDEN), jnp.float32, -bound1, bound1)
    w2_row = jax.random.uniform(k3, (1, HIDDEN), jnp.float32, -bound2, bound2)
    b2 = jax.random.uniform(k4, (1, 1), jnp.float32, -bound2, bound2)
    return w1, b1, w2_row, b2


def reference_forward(z, w1, b1, w2_row, b2):
    h = z @ w1 + b1
    h = jnp.where(h > 0, h, 0.2 * h)
    logits = h @ w2_row.T + b2
    return jax.nn.sigmoid(logits)


if __name__ == "__main__":
    key = jax.random.PRNGKey(0)
    kz1, kz2, kp = jax.random.split(key, 3)
    w1, b1, w2_row, b2 = init_params(kp)

    # Tolerance reflects the bf16 MXU operands plus the EUP approximate
    # reciprocal in the sigmoid — negligible for a discriminator probability.
    ATOL = 1e-2

    # Small batch (single grid step path).
    B1 = 8
    z1 = jax.random.normal(kz1, (B1, LATENT_DIM), jnp.float32)
    out1 = jax.block_until_ready(discriminator_z_forward(z1, w1, b1, w2_row, b2))
    ref1 = reference_forward(z1, w1, b1, w2_row, b2)
    assert out1.shape == (B1, 1)
    assert jnp.allclose(out1, ref1, atol=ATOL, rtol=ATOL), "mismatch vs reference (B=8)"

    # Non-multiple-of-8 batch: exercises the pad-free ragged last block and
    # the >= 2-grid-step path.
    B2 = 20
    z2 = jax.random.normal(kz2, (B2, LATENT_DIM), jnp.float32)
    out2 = jax.block_until_ready(discriminator_z_forward(z2, w1, b1, w2_row, b2))
    ref2 = reference_forward(z2, w1, b1, w2_row, b2)
    assert out2.shape == (B2, 1)
    assert jnp.allclose(out2, ref2, atol=ATOL, rtol=ATOL), "mismatch vs reference (B=20)"
    assert not jnp.any(jnp.isnan(out2)), "NaN in valid output rows"

    print("KERNEL_OK")
</pallas_src>

<mosaic_0001>
module attributes {stable_mosaic.version = 11 : i64} {
  func.func @_disc_z_kernel(%arg0: i32, %arg1: memref<8x128xf32, #tpu.memory_space<vmem>>, %arg2: memref<128x256xbf16, #tpu.memory_space<vmem>>, %arg3: memref<1x256xf32, #tpu.memory_space<vmem>>, %arg4: memref<1x256xf32, #tpu.memory_space<vmem>>, %arg5: memref<1x1xf32, #tpu.memory_space<vmem>>, %arg6: memref<8x1xf32, #tpu.memory_space<vmem>>) attributes {dimension_semantics = [#tpu.dimension_semantics<parallel>], iteration_bounds = array<i64: 1>, scalar_prefetch = 0 : i64, scratch_operands = 0 : i64, tpu.core_type = #tpu.core_type<tc>, window_params = [{transform_indices = @transform_0, window_bounds = array<i64: 8, 128>}, {pipeline_mode = #tpu.pipeline_mode<synchronous>, transform_indices = @transform_1, window_bounds = array<i64: 128, 256>}, {pipeline_mode = #tpu.pipeline_mode<synchronous>, transform_indices = @transform_2, window_bounds = array<i64: 1, 256>}, {pipeline_mode = #tpu.pipeline_mode<synchronous>, transform_indices = @transform_3, window_bounds = array<i64: 1, 256>}, {pipeline_mode = #tpu.pipeline_mode<synchronous>, transform_indices = @transform_4, window_bounds = array<i64: 1, 1>}, {transform_indices = @transform_5, window_bounds = array<i64: 8, 1>}]} {
    %c0 = arith.constant 0 : index
    %c0_0 = arith.constant 0 : index
    %0 = vector.load %arg1[%c0, %c0_0] : memref<8x128xf32, #tpu.memory_space<vmem>>, vector<8x128xf32>
    %1 = arith.truncf %0 : vector<8x128xf32> to vector<8x128xbf16>
    %c0_1 = arith.constant 0 : index
    %c0_2 = arith.constant 0 : index
    %2 = vector.load %arg2[%c0_1, %c0_2] : memref<128x256xbf16, #tpu.memory_space<vmem>>, vector<128x256xbf16>
    %cst = arith.constant dense<0.000000e+00> : vector<8x256xf32>
    %3 = tpu.matmul %1, %2, %cst {dimension_numbers = #tpu.dot_dimension_numbers<[1], [0], [0], [1], [0, 0, 1, 1], [], []>} : vector<8x128xbf16>, vector<128x256xbf16>, vector<8x256xf32> -> vector<8x256xf32>
    %c0_3 = arith.constant 0 : index
    %c0_4 = arith.constant 0 : index
    %4 = vector.load %arg3[%c0_3, %c0_4] : memref<1x256xf32, #tpu.memory_space<vmem>>, vector<1x256xf32>
    %5 = vector.broadcast %4 : vector<1x256xf32> to vector<8x256xf32>
    %6 = arith.addf %3, %5 : vector<8x256xf32>
    %cst_5 = arith.constant 2.000000e-01 : f32
    %7 = vector.broadcast %cst_5 : f32 to vector<8x256xf32>
    %8 = arith.mulf %7, %6 : vector<8x256xf32>
    %9 = arith.maximumf %6, %8 : vector<8x256xf32>
    %c0_6 = arith.constant 0 : index
    %c0_7 = arith.constant 0 : index
    %10 = vector.load %arg4[%c0_6, %c0_7] : memref<1x256xf32, #tpu.memory_space<vmem>>, vector<1x256xf32>
    %11 = vector.broadcast %10 : vector<1x256xf32> to vector<8x256xf32>
    %12 = arith.mulf %9, %11 : vector<8x256xf32>
    %cst_8 = arith.constant dense<0.000000e+00> : vector<8xf32>
    %13 = vector.multi_reduction <add>, %12, %cst_8 [1] : vector<8x256xf32> to vector<8xf32>
    %14 = vector.shape_cast %13 : vector<8xf32> to vector<8x1xf32>
    %c0_9 = arith.constant 0 : index
    %c0_10 = arith.constant 0 : index
    %15 = vector.load %arg5[%c0_9, %c0_10] : memref<1x1xf32, #tpu.memory_space<vmem>>, vector<1x1xf32>
    %16 = vector.broadcast %15 : vector<1x1xf32> to vector<8x1xf32>
    %17 = arith.addf %14, %16 : vector<8x1xf32>
    %cst_11 = arith.constant 0.000000e+00 : f32
    %18 = vector.broadcast %cst_11 : f32 to vector<8x1xf32>
    %19 = arith.subf %18, %17 : vector<8x1xf32>
    %20 = math.exp %19 : vector<8x1xf32>
    %cst_12 = arith.constant 1.000000e+00 : f32
    %21 = vector.broadcast %cst_12 : f32 to vector<8x1xf32>
    %22 = arith.addf %21, %20 : vector<8x1xf32>
    %23 = tpu.reciprocal %22 {approx = true} : vector<8x1xf32> -> vector<8x1xf32>
    %c0_13 = arith.constant 0 : index
    %c0_14 = arith.constant 0 : index
    %24 = vector.load %arg6[%c0_13, %c0_14] : memref<8x1xf32, #tpu.memory_space<vmem>>, vector<8x1xf32>
    tpu.vector_store %arg6[%c0_13, %c0_14], %23 {strides = array<i32>} : memref<8x1xf32, #tpu.memory_space<vmem>>, vector<8x1xf32>,
    return
  }
  func.func @transform_0(%arg0: i32) -> (i32, i32) {
    %c0_i32 = arith.constant 0 : i32
    %c0_i32_0 = arith.constant 0 : i32
    return %arg0, %c0_i32 : i32, i32
  }
  func.func @transform_1(%arg0: i32) -> (i32, i32) {
    %c0_i32 = arith.constant 0 : i32
    %c0_i32_0 = arith.constant 0 : i32
    %c0_i32_1 = arith.constant 0 : i32
    return %c0_i32, %c0_i32_0 : i32, i32
  }
  func.func @transform_2(%arg0: i32) -> (i32, i32) {
    %c0_i32 = arith.constant 0 : i32
    %c0_i32_0 = arith.constant 0 : i32
    %c0_i32_1 = arith.constant 0 : i32
    return %c0_i32, %c0_i32_0 : i32, i32
  }
  func.func @transform_3(%arg0: i32) -> (i32, i32) {
    %c0_i32 = arith.constant 0 : i32
    %c0_i32_0 = arith.constant 0 : i32
    %c0_i32_1 = arith.constant 0 : i32
    return %c0_i32, %c0_i32_0 : i32, i32
  }
  func.func @transform_4(%arg0: i32) -> (i32, i32) {
    %c0_i32 = arith.constant 0 : i32
    %c0_i32_0 = arith.constant 0 : i32
    %c0_i32_1 = arith.constant 0 : i32
    return %c0_i32, %c0_i32_0 : i32, i32
  }
  func.func @transform_5(%arg0: i32) -> (i32, i32) {
    %c0_i32 = arith.constant 0 : i32
    %c0_i32_0 = arith.constant 0 : i32
    return %arg0, %c0_i32 : i32, i32
  }
}

</mosaic_0001>

<bundles_post_ra>
// kernel: tpu_custom_call.1
= control target key start
LH: loop header
LB: loop body
LE: loop exit
PB: predicated region body
PF: predicated region fallthrough
CT: control target
= control target key end

     0   :  { %s408_s0 = inlined_call_operand.hbm [shape: f32[8,128], index: 0, kind: input, shape index: {}]   ;;  %s409_s1 = inlined_call_operand.hbm [shape: bf16[128,256], index: 1, kind: input, shape index: {}]   ;;  %s410_s2 = inlined_call_operand.vmem [shape: f32[1,256], index: 2, kind: input, shape index: {}]   ;;  %s411_s3 = inlined_call_operand.vmem [shape: f32[1,256], index: 3, kind: input, shape index: {}]   ;;  %s412_s4 = inlined_call_operand.<no memory space> [shape: f32[1,1], index: 4, kind: input, shape index: {}]   ;;  %s413_s5 = inlined_call_operand.vmem [shape: f32[8,1], index: 5, kind: output, shape index: {}]  }
   0x1   :  { %v10_v0 = vstv %s412_s4 }
   0x2   :  { %11 = vst [vmem:[#allocation2] sm:$0x1] %v10_v0 }
   0x3   :  { %12 = vsyncpa [#allocation4], 0  ;;  %s19_s22 = sshll.u32 %s408_s0, 4  ;;  %s20_s22 = int_to_ptr.hbm [resolvable:$true] %s19_s22 }
   0x4   :  { %13 = vsyncpa [#allocation6], 0  ;;  %s356_s23 = smov [#allocation3]   ;;  %s29_s27 = sshll.u32 %s409_s1, 4  ;;  %s30_s27 = int_to_ptr.hbm [resolvable:$true] %s29_s27 }
   0x5   :  { %s21_s24 = sshll.u32 %s356_s23, 4  ;;  %s357_s28 = smov [#allocation5]   ;;  %s22_s24 = int_to_ptr.vmem [resolvable:$true] %s21_s24 }
   0x6   :  { %24 = dma.hbm_to_vmem [thread:$0]  %s20_s22, 128, %s22_s24, [#allocation4]  }
   0x7   :  { %s31_s29 = sshll.u32 %s357_s28, 4  ;;  %s358_s4 = smov 128   ;;  %s32_s29 = int_to_ptr.vmem [resolvable:$true] %s31_s29 }
   0x8   :  { %s359_s30 = smov 8  }
   0x9   :  { %37 = dma.hbm_to_vmem [thread:$0]  %s30_s27, 2048, %s32_s29, [#allocation6], %s358_s4, %s358_s4, %s359_s30  }
   0xa   :  { %352 = dma.done.wait [#allocation4], 128  }
   0xb   :  { %353 = vsyncadd [#allocation4], 4294967168 }
   0xc   :  { %354 = dma.done.wait [#allocation6], 2048  }
   0xd   :  { %355 = vsyncadd [#allocation6], 4294965248  ;;  %v273_v1 = vld [vmem:[#allocation5 + $0x70] sm:$0xf]  ;;  %v294_v2 = vld [vmem:[#allocation5 + $0x74] sm:$0xf0] }
   0xe   :  { %v293_v3 = vld [vmem:[#allocation5 + $0x74] sm:$0xf]  ;;  %v274_v4 = vor.u32 %v294_v2, %v273_v1  ;;  %v275_v5 = vld [vmem:[#allocation5 + $0x78] sm:$0xf0]  ;;  %v265_v6 = vld [vmem:[#allocation5 + $0x60] sm:$0xf] }
   0xf   :  { %v292_v7 = vld [vmem:[#allocation5 + $0x64] sm:$0xf0]  ;;  %v278_v8 = vor.u32 %v293_v3, %v275_v5  ;;  %v291_v9 = vld [vmem:[#allocation5 + $0x64] sm:$0xf]  ;;  %v267_v10 = vld [vmem:[#allocation5 + $0x68] sm:$0xf0] }
  0x10   :  { %156 = vmatpush.bf16.msra.mxu0 %v274_v4  ;;  %v266_v11 = vor.u32 %v292_v7, %v265_v6  ;;  %v270_v12 = vor.u32 %v291_v9, %v267_v10  ;;  %v257_v13 = vld [vmem:[#allocation5 + $0x50] sm:$0xf]  ;;  %v290_v14 = vld [vmem:[#allocation5 + $0x54] sm:$0xf0]  ;;  %v289_v15 = vld [vmem:[#allocation5 + $0x54] sm:$0xf] }
  0x11   :  { %169 = vmatpush.bf16.msra.mxu1 %v278_v8  ;;  %v259_v16 = vld [vmem:[#allocation5 + $0x58] sm:$0xf0]  ;;  %v258_v17 = vor.u32 %v290_v14, %v257_v13  ;;  %v249_v19 = vld [vmem:[#allocation5 + $0x40] sm:$0xf]  ;;  %v288_v20 = vld [vmem:[#allocation5 + $0x44] sm:$0xf0] }
  0x12   :  { %v262_v18 = vor.u32 %v289_v15, %v259_v16  ;;  %v287_v21 = vld [vmem:[#allocation5 + $0x44] sm:$0xf]  ;;  %v251_v22 = vld [vmem:[#allocation5 + $0x48] sm:$0xf0]  ;;  %v250_v23 = vor.u32 %v288_v20, %v249_v19  ;;  %v241_v25 = vld [vmem:[#allocation5 + $0x30] sm:$0xf] }
  0x13   :  { %v254_v24 = vor.u32 %v287_v21, %v251_v22  ;;  %v286_v26 = vld [vmem:[#allocation5 + $0x34] sm:$0xf0]  ;;  %v285_v27 = vld [vmem:[#allocation5 + $0x34] sm:$0xf]  ;;  %v243_v28 = vld [vmem:[#allocation5 + $0x38] sm:$0xf0] }
  0x14   :  { %157 = vmatpush.bf16.msra.mxu0 %v266_v11  ;;  %v242_v29 = vor.u32 %v286_v26, %v241_v25  ;;  %v246_v30 = vor.u32 %v285_v27, %v243_v28  ;;  %v233_v31 = vld [vmem:[#allocation5 + $0x20] sm:$0xf]  ;;  %v284_v32 = vld [vmem:[#allocation5 + $0x24] sm:$0xf0]  ;;  %v283_v33 = vld [vmem:[#allocation5 + $0x24] sm:$0xf] }
  0x15   :  { %170 = vmatpush.bf16.msra.mxu1 %v270_v12  ;;  %v235_v34 = vld [vmem:[#allocation5 + $0x28] sm:$0xf0]  ;;  %v234_v35 = vor.u32 %v284_v32, %v233_v31  ;;  %v225_v37 = vld [vmem:[#allocation5 + $0x10] sm:$0xf]  ;;  %v282_v38 = vld [vmem:[#allocation5 + $0x14] sm:$0xf0] }
  0x16   :  { %v238_v36 = vor.u32 %v283_v33, %v235_v34  ;;  %v281_v39 = vld [vmem:[#allocation5 + $0x14] sm:$0xf]  ;;  %v227_v40 = vld [vmem:[#allocation5 + $0x18] sm:$0xf0]  ;;  %v226_v41 = vor.u32 %v282_v38, %v225_v37  ;;  %v217_v43 = vld [vmem:[#allocation5] sm:$0xf] }
  0x17   :  { %v230_v42 = vor.u32 %v281_v39, %v227_v40  ;;  %v280_v44 = vld [vmem:[#allocation5 + $0x4] sm:$0xf0]  ;;  %v279_v45 = vld [vmem:[#allocation5 + $0x4] sm:$0xf]  ;;  %v219_v46 = vld [vmem:[#allocation5 + $0x8] sm:$0xf0] }
  0x18   :  { %158 = vmatpush.bf16.msra.mxu0 %v258_v17  ;;  %v218_v47 = vor.u32 %v280_v44, %v217_v43  ;;  %v52_v48 = vld [vmem:[#allocation3] sm:$0xff]  ;;  %v222_v49 = vor.u32 %v279_v45, %v219_v46  ;;  %v299_v6 = vld [vmem:[#allocation2] ss:$0 sm:$0xff]  ;;  %vm207_vm0 = vcmask 7168  }
  0x19   :  { %171 = vmatpush.bf16.msra.mxu1 %v262_v18  ;;  %v53_v50 = vpack.c.bf16 %v52_v48, %v52_v48  ;;  %v70_v51 = vld [vmem:[%s410_s2] sm:$0x3] }
  0x1a   :  { %v72_v52 = vperm.slane %v70_v51, 0  ;;  %v73_v53 = vperm.slane %v70_v51, 1  ;;  %v186_v55 = vld [vmem:[%s411_s3] sm:$0x3] }
  0x1b   :  { %v188_v60 = vperm.slane %v186_v55, 0  ;;  %v189_v62 = vperm.slane %v186_v55, 1 }
  0x1c   :  { %159 = vmatpush.bf16.msra.mxu0 %v250_v23 }
  0x1d   :  { %172 = vmatpush.bf16.msra.mxu1 %v254_v24 }
  0x20   :  { %160 = vmatpush.bf16.msra.mxu0 %v242_v29 }
  0x21   :  { %173 = vmatpush.bf16.msra.mxu1 %v246_v30 }
  0x24   :  { %161 = vmatpush.bf16.msra.mxu0 %v234_v35 }
  0x25   :  { %174 = vmatpush.bf16.msra.mxu1 %v238_v36 }
  0x28   :  { %162 = vmatpush.bf16.msra.mxu0 %v226_v41 }
  0x29   :  { %175 = vmatpush.bf16.msra.mxu1 %v230_v42 }
  0x2c   :  { %163 = vmatpush.bf16.msra.mxu0 %v218_v47 }
  0x2d   :  { %176 = vmatpush.bf16.msra.mxu1 %v222_v49 }
  0x2f   :  { %164 = vmatmul.bf16.vlgmr.msra.gmra.mxu0 %v53_v50 }
  0x30   :  { %177 = vmatmul.bf16.vlgmr.msra.gmra.mxu1 %v53_v50 }
  0xac   :  { %v165_v54 = vpop.f32.mrf.mxu0 }
  0xad   :  { %v166_v56 = vadd.f32 %v165_v54, %v72_v52  ;;  %v178_v57 = vpop.f32.mrf.mxu1 }
  0xae   :  { %v179_v58 = vadd.f32 %v178_v57, %v73_v53 }
  0xaf   :  { %v182_v59 = vmul.f32 0.2, %v166_v56 }
  0xb0   :  { %v183_v61 = vmul.f32 0.2, %v179_v58 }
  0xb1   :  { %v184_v63 = vmax.f32 %v166_v56, %v182_v59 }
  0xb2   :  { %v185_v0 = vmax.f32 %v179_v58, %v183_v61 }
  0xb3   :  { %v192_v1 = vmul.f32 %v188_v60, %v184_v63 }
  0xb4   :  { %v167_v2 = vpop.f32.mrf.mxu0  ;;  %v193_v3 = vmul.f32 %v189_v62, %v185_v0 }
  0xb5   :  { %v180_v4 = vpop.f32.mrf.mxu1 }
  0xb6   :  { %v194_v5 = vadd.f32 %v193_v3, %v192_v1 }
  0xb8   :  { %195 = vadd.xlane.f32.xlu0 %v194_v5 }
 0x12b   :  { %v196_v7 = vpop.xlane.xlu0 %195 }
 0x12c   :  { %v201_v8 = vadd.f32 %v299_v6, %v196_v7 }
 0x12e   :  { %v202_v9 = vsub.f32 0.0, %v201_v8 }
 0x130   :  { %v203_v10 = vmul.f32 1.442695, %v202_v9 }
 0x132   :  { %300 = vpow2.f32 %v203_v10 }
 0x138   :  { %v301_v11 = vpop.eup %300 }
 0x139   :  { %v205_v12 = vadd.f32 1.0, %v301_v11 }
 0x13b   :  { %302 = vrcp.f32 %v205_v12 }
 0x141   :  { %v303_v13 = vpop.eup %302 }
 0x142   :  { %208 = vst.msk [vmem:[%s413_s5] sm:$0xff] %vm207_vm0, %v303_v13 }
 0x143   :  { %213 = vsyncpa [#allocation4], 1 }
 0x144   :  { %214 = vsyncpa [#allocation6], 1 }

</bundles_post_ra>
